<compile_context>
chip_gen: v5e
topology: v5e:2x2
jax: 0.10.0
libtpu: 0.0.40
codegen_flags: <defaults>
</compile_context>

<pallas_src>
import functools

import jax
import jax.numpy as jnp
from jax.experimental import pallas as pl
from jax.experimental.pallas import tpu as pltpu


def _rnn_kernel(x_ref, wih_t_ref, whh_t_ref, b_ref, wfc_t_ref, bfc_ref, out_ref,
                *, batch, seq):
    # x_ref:     (B*S, Din) bf16   batch-first flattened input (row = b*S + t)
    # wih_t_ref: (Din, H)   bf16   input->hidden weight, transposed
    # whh_t_ref: (H, H)     bf16   hidden->hidden weight, transposed
    # b_ref:     (1, H)     f32    b_ih + b_hh (combined)
    # wfc_t_ref: (H, Opad)  bf16   fc weight, transposed, zero-padded columns
    # bfc_ref:   (1, Opad)  f32    fc bias, padded columns = -1e30
    # out_ref:   (S, Opad)  f32    log-probabilities (padded cols are junk)
    B, S = batch, seq
    H = whh_t_ref.shape[0]

    # ---- Hoisted input projection: one MXU call covering all B*S rows ----
    pre_all = jnp.dot(x_ref[...], wih_t_ref[...],
                      preferred_element_type=jnp.float32) + b_ref[...]      # (B*S, H) f32

    # W_hh loaded once, reused by every unrolled step.
    whh = whh_t_ref[...]                                                    # (H, H) bf16

    # ---- Recurrence, statically unrolled (S is a trace-time constant) ----
    h = jnp.zeros((B, H), dtype=jnp.float32)
    hs = []
    for t in range(S):
        # Gather the B rows of pre_all belonging to time step t (row b*S + t).
        # Static slices + a tiny sublane concat: this is the batch-first ->
        # time-major permutation done in-register, so x is never transposed in HBM.
        rows = [pre_all[b * S + t:b * S + t + 1, :] for b in range(B)]
        pre_t = rows[0] if B == 1 else jnp.concatenate(rows, axis=0)        # (B, H)
        # h stays f32 between steps; cast only for the MXU operand.
        h = jnp.tanh(pre_t + jnp.dot(h.astype(jnp.bfloat16), whh,
                                     preferred_element_type=jnp.float32))   # (B, H) f32
        hs.append(h)

    # ---- Batch sum (torch.sum(out, dim=0)) done once after the loop ----
    summed = jnp.concatenate(
        [jnp.sum(h_t, axis=0, keepdims=True) for h_t in hs], axis=0)        # (S, H) f32

    # Dropout(p=0.5): eval-mode identity.

    # ---- fc + LogSoftmax over the lane-dense padded class axis ----
    logits = jnp.dot(summed.astype(jnp.bfloat16), wfc_t_ref[...],
                     preferred_element_type=jnp.float32) + bfc_ref[...]     # (S, Opad)
    m = jnp.max(logits, axis=1, keepdims=True)
    z = logits - m
    lse = jnp.log(jnp.sum(jnp.exp(z), axis=1, keepdims=True))
    out_ref[...] = z - lse


def rnn_forward(x, w_ih, w_hh, b_ih, b_hh, w_fc, b_fc):
    """x: (B, S, Din) float32 (batch_first, like the PyTorch module)."""
    B, S, Din = x.shape
    H = w_hh.shape[0]
    O = w_fc.shape[0]
    O_pad = ((O + 127) // 128) * 128                          # lane-dense class axis

    # Batch-first flatten is a free row-major view (NOT a transpose / extra HBM pass).
    x2d = x.reshape(B * S, Din).astype(jnp.bfloat16)          # (B*S, Din)
    wih_t = jnp.transpose(w_ih).astype(jnp.bfloat16)          # (Din, H)
    whh_t = jnp.transpose(w_hh).astype(jnp.bfloat16)          # (H, H)
    b = (b_ih + b_hh).reshape(1, H).astype(jnp.float32)       # (1, H)
    # Pad fc weight with zero columns and fc bias with -1e30 so padded logits
    # vanish under the in-kernel log_softmax.
    wfc_t = jnp.pad(jnp.transpose(w_fc).astype(jnp.float32),
                    ((0, 0), (0, O_pad - O))).astype(jnp.bfloat16)          # (H, Opad)
    bfc = jnp.pad(b_fc.astype(jnp.float32), (0, O_pad - O),
                  constant_values=-1e30).reshape(1, O_pad)                  # (1, Opad)

    kernel = functools.partial(_rnn_kernel, batch=B, seq=S)

    grid_spec = pltpu.PrefetchScalarGridSpec(
        num_scalar_prefetch=0,
        grid=(1,),
        in_specs=[
            pl.BlockSpec((B * S, Din), lambda i: (0, 0)),
            pl.BlockSpec((Din, H), lambda i: (0, 0)),
            pl.BlockSpec((H, H), lambda i: (0, 0)),
            pl.BlockSpec((1, H), lambda i: (0, 0)),
            pl.BlockSpec((H, O_pad), lambda i: (0, 0)),
            pl.BlockSpec((1, O_pad), lambda i: (0, 0)),
        ],
        out_specs=pl.BlockSpec((S, O_pad), lambda i: (0, 0)),
    )

    out_pad = pl.pallas_call(
        kernel,
        out_shape=jax.ShapeDtypeStruct((S, O_pad), jnp.float32),
        grid_spec=grid_spec,
        compiler_params=pltpu.CompilerParams(
            dimension_semantics=("arbitrary",)),
    )(x2d, wih_t, whh_t, b, wfc_t, bfc)

    return out_pad[:, :O]


def rnn_forward_ref_f32(x, w_ih, w_hh, b_ih, b_hh, w_fc, b_fc):
    """Pure-f32 JAX reference with the original module semantics."""
    B, S, Din = x.shape
    H = w_hh.shape[0]
    h = jnp.zeros((B, H), jnp.float32)
    outs = []
    for t in range(S):
        h = jnp.tanh(x[:, t, :] @ w_ih.T + b_ih + h @ w_hh.T + b_hh)
        outs.append(h)
    out = jnp.stack(outs, axis=1)                 # (B, S, H)
    out = jnp.sum(out, axis=0)                    # (S, H)  == torch.sum(out, dim=0)
    logits = out @ w_fc.T + b_fc                  # (S, O)
    return jax.nn.log_softmax(logits, axis=1)


def rnn_forward_ref_mixed(x, w_ih, w_hh, b_ih, b_hh, w_fc, b_fc):
    """Reference mirroring the kernel's bf16-operand / f32-accumulate numerics."""
    B, S, Din = x.shape
    H = w_hh.shape[0]
    x_bf = x.astype(jnp.bfloat16)
    wih_t = jnp.transpose(w_ih).astype(jnp.bfloat16)
    whh_t = jnp.transpose(w_hh).astype(jnp.bfloat16)
    wfc_t = jnp.transpose(w_fc).astype(jnp.bfloat16)
    b = (b_ih + b_hh).astype(jnp.float32)
    h = jnp.zeros((B, H), jnp.float32)
    rows = []
    for t in range(S):
        pre = jnp.dot(x_bf[:, t, :], wih_t, preferred_element_type=jnp.float32) + b
        h = jnp.tanh(pre + jnp.dot(h.astype(jnp.bfloat16), whh_t,
                                   preferred_element_type=jnp.float32))
        rows.append(jnp.sum(h, axis=0, keepdims=True))
    summed = jnp.concatenate(rows, axis=0)
    logits = jnp.dot(summed.astype(jnp.bfloat16), wfc_t,
                     preferred_element_type=jnp.float32) + b_fc.astype(jnp.float32)
    return jax.nn.log_softmax(logits, axis=1)


if __name__ == "__main__":
    B, S, Din, H, O = 2, 8, 16, 32, 5

    key = jax.random.PRNGKey(0)
    ks = jax.random.split(key, 7)
    bound = 1.0 / (H ** 0.5)
    w_ih = jax.random.uniform(ks[0], (H, Din), jnp.float32, -bound, bound)
    w_hh = jax.random.uniform(ks[1], (H, H), jnp.float32, -bound, bound)
    b_ih = jax.random.uniform(ks[2], (H,), jnp.float32, -bound, bound)
    b_hh = jax.random.uniform(ks[3], (H,), jnp.float32, -bound, bound)
    w_fc = jax.random.uniform(ks[4], (O, H), jnp.float32, -bound, bound)
    b_fc = jax.random.uniform(ks[5], (O,), jnp.float32, -bound, bound)
    x = jax.random.normal(ks[6], (B, S, Din), jnp.float32)

    out = rnn_forward(x, w_ih, w_hh, b_ih, b_hh, w_fc, b_fc)
    out = jax.block_until_ready(out)
    assert out.shape == (S, O)

    # Tight check vs. a reference using identical bf16/f32 numerics.
    ref_mixed = rnn_forward_ref_mixed(x, w_ih, w_hh, b_ih, b_hh, w_fc, b_fc)
    assert jnp.allclose(out, ref_mixed, atol=1e-3, rtol=1e-3), "mismatch vs mixed-precision reference"

    # Looser sanity check vs. the pure-f32 module semantics (bf16 MXU quantization).
    ref_f32 = rnn_forward_ref_f32(x, w_ih, w_hh, b_ih, b_hh, w_fc, b_fc)
    assert jnp.allclose(out, ref_f32, atol=5e-2, rtol=0.0), "mismatch vs f32 reference"

    print("KERNEL_OK")
</pallas_src>

<mosaic_0001>
module attributes {stable_mosaic.version = 11 : i64} {
  func.func @_rnn_kernel(%arg0: i32, %arg1: memref<16x16xbf16, #tpu.memory_space<vmem>>, %arg2: memref<16x32xbf16, #tpu.memory_space<vmem>>, %arg3: memref<32x32xbf16, #tpu.memory_space<vmem>>, %arg4: memref<1x32xf32, #tpu.memory_space<vmem>>, %arg5: memref<32x128xbf16, #tpu.memory_space<vmem>>, %arg6: memref<1x128xf32, #tpu.memory_space<vmem>>, %arg7: memref<8x128xf32, #tpu.memory_space<vmem>>) attributes {dimension_semantics = [#tpu.dimension_semantics<arbitrary>], iteration_bounds = array<i64: 1>, scalar_prefetch = 0 : i64, scratch_operands = 0 : i64, tpu.core_type = #tpu.core_type<tc>, window_params = [{pipeline_mode = #tpu.pipeline_mode<synchronous>, transform_indices = @transform_0, window_bounds = array<i64: 16, 16>}, {pipeline_mode = #tpu.pipeline_mode<synchronous>, transform_indices = @transform_1, window_bounds = array<i64: 16, 32>}, {pipeline_mode = #tpu.pipeline_mode<synchronous>, transform_indices = @transform_2, window_bounds = array<i64: 32, 32>}, {pipeline_mode = #tpu.pipeline_mode<synchronous>, transform_indices = @transform_3, window_bounds = array<i64: 1, 32>}, {pipeline_mode = #tpu.pipeline_mode<synchronous>, transform_indices = @transform_4, window_bounds = array<i64: 32, 128>}, {pipeline_mode = #tpu.pipeline_mode<synchronous>, transform_indices = @transform_5, window_bounds = array<i64: 1, 128>}, {pipeline_mode = #tpu.pipeline_mode<synchronous>, transform_indices = @transform_6, window_bounds = array<i64: 8, 128>}]} {
    %c0 = arith.constant 0 : index
    %c0_0 = arith.constant 0 : index
    %0 = vector.load %arg1[%c0, %c0_0] : memref<16x16xbf16, #tpu.memory_space<vmem>>, vector<16x16xbf16>
    %c0_1 = arith.constant 0 : index
    %c0_2 = arith.constant 0 : index
    %1 = vector.load %arg2[%c0_1, %c0_2] : memref<16x32xbf16, #tpu.memory_space<vmem>>, vector<16x32xbf16>
    %cst = arith.constant dense<0.000000e+00> : vector<16x32xf32>
    %2 = tpu.matmul %0, %1, %cst {dimension_numbers = #tpu.dot_dimension_numbers<[1], [0], [0], [1], [0, 0, 1, 1], [], []>} : vector<16x16xbf16>, vector<16x32xbf16>, vector<16x32xf32> -> vector<16x32xf32>
    %c0_3 = arith.constant 0 : index
    %c0_4 = arith.constant 0 : index
    %3 = vector.load %arg4[%c0_3, %c0_4] : memref<1x32xf32, #tpu.memory_space<vmem>>, vector<1x32xf32>
    %4 = vector.broadcast %3 : vector<1x32xf32> to vector<16x32xf32>
    %5 = arith.addf %2, %4 : vector<16x32xf32>
    %c0_5 = arith.constant 0 : index
    %c0_6 = arith.constant 0 : index
    %6 = vector.load %arg3[%c0_5, %c0_6] : memref<32x32xbf16, #tpu.memory_space<vmem>>, vector<32x32xbf16>
    %cst_7 = arith.constant 0.000000e+00 : f32
    %7 = vector.broadcast %cst_7 : f32 to vector<2x32xf32>
    %8 = vector.extract_strided_slice %5 {offsets = [0, 0], sizes = [1, 32], strides = [1, 1]} : vector<16x32xf32> to vector<1x32xf32>
    %9 = vector.extract_strided_slice %5 {offsets = [8, 0], sizes = [1, 32], strides = [1, 1]} : vector<16x32xf32> to vector<1x32xf32>
    %10 = tpu.concatenate %8, %9 in 0 : vector<1x32xf32>, vector<1x32xf32> -> vector<2x32xf32>
    %11 = arith.truncf %7 : vector<2x32xf32> to vector<2x32xbf16>
    %cst_8 = arith.constant dense<0.000000e+00> : vector<2x32xf32>
    %12 = tpu.matmul %11, %6, %cst_8 {dimension_numbers = #tpu.dot_dimension_numbers<[1], [0], [0], [1], [0, 0, 1, 1], [], []>} : vector<2x32xbf16>, vector<32x32xbf16>, vector<2x32xf32> -> vector<2x32xf32>
    %13 = arith.addf %10, %12 : vector<2x32xf32>
    %14 = math.tanh %13 : vector<2x32xf32>
    %15 = vector.extract_strided_slice %5 {offsets = [1, 0], sizes = [1, 32], strides = [1, 1]} : vector<16x32xf32> to vector<1x32xf32>
    %16 = vector.extract_strided_slice %5 {offsets = [9, 0], sizes = [1, 32], strides = [1, 1]} : vector<16x32xf32> to vector<1x32xf32>
    %17 = tpu.concatenate %15, %16 in 0 : vector<1x32xf32>, vector<1x32xf32> -> vector<2x32xf32>
    %18 = arith.truncf %14 : vector<2x32xf32> to vector<2x32xbf16>
    %cst_9 = arith.constant dense<0.000000e+00> : vector<2x32xf32>
    %19 = tpu.matmul %18, %6, %cst_9 {dimension_numbers = #tpu.dot_dimension_numbers<[1], [0], [0], [1], [0, 0, 1, 1], [], []>} : vector<2x32xbf16>, vector<32x32xbf16>, vector<2x32xf32> -> vector<2x32xf32>
    %20 = arith.addf %17, %19 : vector<2x32xf32>
    %21 = math.tanh %20 : vector<2x32xf32>
    %22 = vector.extract_strided_slice %5 {offsets = [2, 0], sizes = [1, 32], strides = [1, 1]} : vector<16x32xf32> to vector<1x32xf32>
    %23 = vector.extract_strided_slice %5 {offsets = [10, 0], sizes = [1, 32], strides = [1, 1]} : vector<16x32xf32> to vector<1x32xf32>
    %24 = tpu.concatenate %22, %23 in 0 : vector<1x32xf32>, vector<1x32xf32> -> vector<2x32xf32>
    %25 = arith.truncf %21 : vector<2x32xf32> to vector<2x32xbf16>
    %cst_10 = arith.constant dense<0.000000e+00> : vector<2x32xf32>
    %26 = tpu.matmul %25, %6, %cst_10 {dimension_numbers = #tpu.dot_dimension_numbers<[1], [0], [0], [1], [0, 0, 1, 1], [], []>} : vector<2x32xbf16>, vector<32x32xbf16>, vector<2x32xf32> -> vector<2x32xf32>
    %27 = arith.addf %24, %26 : vector<2x32xf32>
    %28 = math.tanh %27 : vector<2x32xf32>
    %29 = vector.extract_strided_slice %5 {offsets = [3, 0], sizes = [1, 32], strides = [1, 1]} : vector<16x32xf32> to vector<1x32xf32>
    %30 = vector.extract_strided_slice %5 {offsets = [11, 0], sizes = [1, 32], strides = [1, 1]} : vector<16x32xf32> to vector<1x32xf32>
    %31 = tpu.concatenate %29, %30 in 0 : vector<1x32xf32>, vector<1x32xf32> -> vector<2x32xf32>
    %32 = arith.truncf %28 : vector<2x32xf32> to vector<2x32xbf16>
    %cst_11 = arith.constant dense<0.000000e+00> : vector<2x32xf32>
    %33 = tpu.matmul %32, %6, %cst_11 {dimension_numbers = #tpu.dot_dimension_numbers<[1], [0], [0], [1], [0, 0, 1, 1], [], []>} : vector<2x32xbf16>, vector<32x32xbf16>, vector<2x32xf32> -> vector<2x32xf32>
    %34 = arith.addf %31, %33 : vector<2x32xf32>
    %35 = math.tanh %34 : vector<2x32xf32>
    %36 = vector.extract_strided_slice %5 {offsets = [4, 0], sizes = [1, 32], strides = [1, 1]} : vector<16x32xf32> to vector<1x32xf32>
    %37 = vector.extract_strided_slice %5 {offsets = [12, 0], sizes = [1, 32], strides = [1, 1]} : vector<16x32xf32> to vector<1x32xf32>
    %38 = tpu.concatenate %36, %37 in 0 : vector<1x32xf32>, vector<1x32xf32> -> vector<2x32xf32>
    %39 = arith.truncf %35 : vector<2x32xf32> to vector<2x32xbf16>
    %cst_12 = arith.constant dense<0.000000e+00> : vector<2x32xf32>
    %40 = tpu.matmul %39, %6, %cst_12 {dimension_numbers = #tpu.dot_dimension_numbers<[1], [0], [0], [1], [0, 0, 1, 1], [], []>} : vector<2x32xbf16>, vector<32x32xbf16>, vector<2x32xf32> -> vector<2x32xf32>
    %41 = arith.addf %38, %40 : vector<2x32xf32>
    %42 = math.tanh %41 : vector<2x32xf32>
    %43 = vector.extract_strided_slice %5 {offsets = [5, 0], sizes = [1, 32], strides = [1, 1]} : vector<16x32xf32> to vector<1x32xf32>
    %44 = vector.extract_strided_slice %5 {offsets = [13, 0], sizes = [1, 32], strides = [1, 1]} : vector<16x32xf32> to vector<1x32xf32>
    %45 = tpu.concatenate %43, %44 in 0 : vector<1x32xf32>, vector<1x32xf32> -> vector<2x32xf32>
    %46 = arith.truncf %42 : vector<2x32xf32> to vector<2x32xbf16>
    %cst_13 = arith.constant dense<0.000000e+00> : vector<2x32xf32>
    %47 = tpu.matmul %46, %6, %cst_13 {dimension_numbers = #tpu.dot_dimension_numbers<[1], [0], [0], [1], [0, 0, 1, 1], [], []>} : vector<2x32xbf16>, vector<32x32xbf16>, vector<2x32xf32> -> vector<2x32xf32>
    %48 = arith.addf %45, %47 : vector<2x32xf32>
    %49 = math.tanh %48 : vector<2x32xf32>
    %50 = vector.extract_strided_slice %5 {offsets = [6, 0], sizes = [1, 32], strides = [1, 1]} : vector<16x32xf32> to vector<1x32xf32>
    %51 = vector.extract_strided_slice %5 {offsets = [14, 0], sizes = [1, 32], strides = [1, 1]} : vector<16x32xf32> to vector<1x32xf32>
    %52 = tpu.concatenate %50, %51 in 0 : vector<1x32xf32>, vector<1x32xf32> -> vector<2x32xf32>
    %53 = arith.truncf %49 : vector<2x32xf32> to vector<2x32xbf16>
    %cst_14 = arith.constant dense<0.000000e+00> : vector<2x32xf32>
    %54 = tpu.matmul %53, %6, %cst_14 {dimension_numbers = #tpu.dot_dimension_numbers<[1], [0], [0], [1], [0, 0, 1, 1], [], []>} : vector<2x32xbf16>, vector<32x32xbf16>, vector<2x32xf32> -> vector<2x32xf32>
    %55 = arith.addf %52, %54 : vector<2x32xf32>
    %56 = math.tanh %55 : vector<2x32xf32>
    %57 = vector.extract_strided_slice %5 {offsets = [7, 0], sizes = [1, 32], strides = [1, 1]} : vector<16x32xf32> to vector<1x32xf32>
    %58 = vector.extract_strided_slice %5 {offsets = [15, 0], sizes = [1, 32], strides = [1, 1]} : vector<16x32xf32> to vector<1x32xf32>
    %59 = tpu.concatenate %57, %58 in 0 : vector<1x32xf32>, vector<1x32xf32> -> vector<2x32xf32>
    %60 = arith.truncf %56 : vector<2x32xf32> to vector<2x32xbf16>
    %cst_15 = arith.constant dense<0.000000e+00> : vector<2x32xf32>
    %61 = tpu.matmul %60, %6, %cst_15 {dimension_numbers = #tpu.dot_dimension_numbers<[1], [0], [0], [1], [0, 0, 1, 1], [], []>} : vector<2x32xbf16>, vector<32x32xbf16>, vector<2x32xf32> -> vector<2x32xf32>
    %62 = arith.addf %59, %61 : vector<2x32xf32>
    %63 = math.tanh %62 : vector<2x32xf32>
    %cst_16 = arith.constant dense<0.000000e+00> : vector<32xf32>
    %64 = vector.multi_reduction <add>, %14, %cst_16 [0] : vector<2x32xf32> to vector<32xf32>
    %65 = vector.shape_cast %64 : vector<32xf32> to vector<1x32xf32>
    %cst_17 = arith.constant dense<0.000000e+00> : vector<32xf32>
    %66 = vector.multi_reduction <add>, %21, %cst_17 [0] : vector<2x32xf32> to vector<32xf32>
    %67 = vector.shape_cast %66 : vector<32xf32> to vector<1x32xf32>
    %cst_18 = arith.constant dense<0.000000e+00> : vector<32xf32>
    %68 = vector.multi_reduction <add>, %28, %cst_18 [0] : vector<2x32xf32> to vector<32xf32>
    %69 = vector.shape_cast %68 : vector<32xf32> to vector<1x32xf32>
    %cst_19 = arith.constant dense<0.000000e+00> : vector<32xf32>
    %70 = vector.multi_reduction <add>, %35, %cst_19 [0] : vector<2x32xf32> to vector<32xf32>
    %71 = vector.shape_cast %70 : vector<32xf32> to vector<1x32xf32>
    %cst_20 = arith.constant dense<0.000000e+00> : vector<32xf32>
    %72 = vector.multi_reduction <add>, %42, %cst_20 [0] : vector<2x32xf32> to vector<32xf32>
    %73 = vector.shape_cast %72 : vector<32xf32> to vector<1x32xf32>
    %cst_21 = arith.constant dense<0.000000e+00> : vector<32xf32>
    %74 = vector.multi_reduction <add>, %49, %cst_21 [0] : vector<2x32xf32> to vector<32xf32>
    %75 = vector.shape_cast %74 : vector<32xf32> to vector<1x32xf32>
    %cst_22 = arith.constant dense<0.000000e+00> : vector<32xf32>
    %76 = vector.multi_reduction <add>, %56, %cst_22 [0] : vector<2x32xf32> to vector<32xf32>
    %77 = vector.shape_cast %76 : vector<32xf32> to vector<1x32xf32>
    %cst_23 = arith.constant dense<0.000000e+00> : vector<32xf32>
    %78 = vector.multi_reduction <add>, %63, %cst_23 [0] : vector<2x32xf32> to vector<32xf32>
    %79 = vector.shape_cast %78 : vector<32xf32> to vector<1x32xf32>
    %80 = tpu.concatenate %65, %67, %69, %71, %73, %75, %77, %79 in 0 : vector<1x32xf32>, vector<1x32xf32>, vector<1x32xf32>, vector<1x32xf32>, vector<1x32xf32>, vector<1x32xf32>, vector<1x32xf32>, vector<1x32xf32> -> vector<8x32xf32>
    %81 = arith.truncf %80 : vector<8x32xf32> to vector<8x32xbf16>
    %c0_24 = arith.constant 0 : index
    %c0_25 = arith.constant 0 : index
    %82 = vector.load %arg5[%c0_24, %c0_25] : memref<32x128xbf16, #tpu.memory_space<vmem>>, vector<32x128xbf16>
    %cst_26 = arith.constant dense<0.000000e+00> : vector<8x128xf32>
    %83 = tpu.matmul %81, %82, %cst_26 {dimension_numbers = #tpu.dot_dimension_numbers<[1], [0], [0], [1], [0, 0, 1, 1], [], []>} : vector<8x32xbf16>, vector<32x128xbf16>, vector<8x128xf32> -> vector<8x128xf32>
    %c0_27 = arith.constant 0 : index
    %c0_28 = arith.constant 0 : index
    %84 = vector.load %arg6[%c0_27, %c0_28] : memref<1x128xf32, #tpu.memory_space<vmem>>, vector<1x128xf32>
    %85 = vector.broadcast %84 : vector<1x128xf32> to vector<8x128xf32>
    %86 = arith.addf %83, %85 : vector<8x128xf32>
    %cst_29 = arith.constant dense<0xFF800000> : vector<8xf32>
    %87 = vector.multi_reduction <maximumf>, %86, %cst_29 [1] : vector<8x128xf32> to vector<8xf32>
    %88 = vector.shape_cast %87 : vector<8xf32> to vector<8x1xf32>
    %89 = vector.broadcast %88 : vector<8x1xf32> to vector<8x128xf32>
    %90 = arith.subf %86, %89 : vector<8x128xf32>
    %91 = math.exp %90 : vector<8x128xf32>
    %cst_30 = arith.constant dense<0.000000e+00> : vector<8xf32>
    %92 = vector.multi_reduction <add>, %91, %cst_30 [1] : vector<8x128xf32> to vector<8xf32>
    %93 = vector.shape_cast %92 : vector<8xf32> to vector<8x1xf32>
    %94 = math.log %93 : vector<8x1xf32>
    %95 = vector.broadcast %94 : vector<8x1xf32> to vector<8x128xf32>
    %96 = arith.subf %90, %95 : vector<8x128xf32>
    %c0_31 = arith.constant 0 : index
    %c0_32 = arith.constant 0 : index
    %97 = vector.load %arg7[%c0_31, %c0_32] : memref<8x128xf32, #tpu.memory_space<vmem>>, vector<8x128xf32>
    tpu.vector_store %arg7[%c0_31, %c0_32], %96 {strides = array<i32>} : memref<8x128xf32, #tpu.memory_space<vmem>>, vector<8x128xf32>,
    return
  }
  func.func @transform_0(%arg0: i32) -> (i32, i32) {
    %c0_i32 = arith.constant 0 : i32
    %c0_i32_0 = arith.constant 0 : i32
    %c0_i32_1 = arith.constant 0 : i32
    return %c0_i32, %c0_i32_0 : i32, i32
  }
  func.func @transform_1(%arg0: i32) -> (i32, i32) {
    %c0_i32 = arith.constant 0 : i32
    %c0_i32_0 = arith.constant 0 : i32
    %c0_i32_1 = arith.constant 0 : i32
    return %c0_i32, %c0_i32_0 : i32, i32
  }
  func.func @transform_2(%arg0: i32) -> (i32, i32) {
    %c0_i32 = arith.constant 0 : i32
    %c0_i32_0 = arith.constant 0 : i32
    %c0_i32_1 = arith.constant 0 : i32
    return %c0_i32, %c0_i32_0 : i32, i32
  }
  func.func @transform_3(%arg0: i32) -> (i32, i32) {
    %c0_i32 = arith.constant 0 : i32
    %c0_i32_0 = arith.constant 0 : i32
    %c0_i32_1 = arith.constant 0 : i32
    return %c0_i32, %c0_i32_0 : i32, i32
  }
  func.func @transform_4(%arg0: i32) -> (i32, i32) {
    %c0_i32 = arith.constant 0 : i32
    %c0_i32_0 = arith.constant 0 : i32
    %c0_i32_1 = arith.constant 0 : i32
    return %c0_i32, %c0_i32_0 : i32, i32
  }
  func.func @transform_5(%arg0: i32) -> (i32, i32) {
    %c0_i32 = arith.constant 0 : i32
    %c0_i32_0 = arith.constant 0 : i32
    %c0_i32_1 = arith.constant 0 : i32
    return %c0_i32, %c0_i32_0 : i32, i32
  }
  func.func @transform_6(%arg0: i32) -> (i32, i32) {
    %c0_i32 = arith.constant 0 : i32
    %c0_i32_0 = arith.constant 0 : i32
    %c0_i32_1 = arith.constant 0 : i32
    return %c0_i32, %c0_i32_0 : i32, i32
  }
}

</mosaic_0001>

<bundles_post_ra>
// kernel: tpu_custom_call.1
= control target key start
LH: loop header
LB: loop body
LE: loop exit
PB: predicated region body
PF: predicated region fallthrough
CT: control target
= control target key end

     0   :  { %11 = vsyncpa [#allocation3], 0  ;;  %s767_s0 = inlined_call_operand.hbm [shape: bf16[16,16], index: 0, kind: input, shape index: {}]   ;;  %s768_s1 = inlined_call_operand.hbm [shape: bf16[16,32], index: 1, kind: input, shape index: {}]   ;;  %s769_s2 = inlined_call_operand.hbm [shape: bf16[32,32], index: 2, kind: input, shape index: {}]   ;;  %s770_s3 = inlined_call_operand.vmem [shape: f32[1,32], index: 3, kind: input, shape index: {}]   ;;  %s771_s4 = inlined_call_operand.hbm [shape: bf16[32,128], index: 4, kind: input, shape index: {}]   ;;  %s772_s5 = inlined_call_operand.vmem [shape: f32[1,128], index: 5, kind: input, shape index: {}]   ;;  %s773_s6 = inlined_call_operand.hbm [shape: f32[8,128], index: 6, kind: output, shape index: {}]  }
   0x1   :  { %12 = vsyncpa [#allocation6], 0 }
   0x2   :  { %13 = vsyncpa [#allocation9], 0 }
   0x3   :  { %14 = vsyncpa [#allocation4], 0  ;;  %s32_s23 = sshll.u32 %s768_s1, 4  ;;  %s666_s24 = smov [#allocation5]   ;;  %s33_s23 = int_to_ptr.hbm [resolvable:$true] %s32_s23 }
   0x4   :  { %s34_s25 = sshll.u32 %s666_s24, 4  ;;  %s19_s28 = sshll.u32 %s767_s0, 4  ;;  %s35_s25 = int_to_ptr.vmem [resolvable:$true] %s34_s25  ;;  %s20_s28 = int_to_ptr.hbm [resolvable:$true] %s19_s28 }
   0x5   :  { %s667_s29 = smov 64   ;;  %s668_s30 = smov 4  }
   0x6   :  { %40 = dma.hbm_to_vmem [thread:$0]  %s33_s23, 128, %s35_s25, [#allocation6], %s667_s29, %s667_s29, %s668_s30  }
   0x7   :  { %s669_s7 = smov [#allocation2]   ;;  %s45_s11 = sshll.u32 %s769_s2, 4  ;;  %s46_s11 = int_to_ptr.hbm [resolvable:$true] %s45_s11 }
   0x8   :  { %s21_s8 = sshll.u32 %s669_s7, 4  ;;  %s60_s13 = sshll.u32 %s771_s4, 4  ;;  %s22_s8 = int_to_ptr.vmem [resolvable:$true] %s21_s8  ;;  %s61_s13 = int_to_ptr.hbm [resolvable:$true] %s60_s13 }
   0x9   :  { %27 = dma.hbm_to_vmem [thread:$0]  %s20_s28, 128, %s22_s8, [#allocation3], %s667_s29, %s667_s29, %s668_s30  }
   0xa   :  { %s670_s14 = smov [#allocation7]   ;;  %s671_s0 = smov [#allocation8]  }
   0xb   :  { %s47_s15 = sshll.u32 %s670_s14, 4  ;;  %s62_s16 = sshll.u32 %s671_s0, 4  ;;  %s48_s15 = int_to_ptr.vmem [resolvable:$true] %s47_s15  ;;  %s63_s16 = int_to_ptr.vmem [resolvable:$true] %s62_s16 }
   0xc   :  { %53 = dma.hbm_to_vmem [thread:$0]  %s46_s11, 256, %s48_s15, [#allocation6], %s667_s29, %s667_s29, %s668_s30  }
   0xd   :  { %68 = dma.hbm_to_vmem [thread:$0]  %s61_s13, 256, %s63_s16, [#allocation9], %s667_s29, %s667_s29, %s668_s30  }
   0xe   :  { %658 = dma.done.wait [#allocation3], 128  }
   0xf   :  { %659 = vsyncadd [#allocation3], 4294967168 }
  0x10   :  { %660 = dma.done.wait [#allocation6], 384  }
  0x11   :  { %661 = vsyncadd [#allocation6], 4294966912 }
  0x12   :  { %662 = dma.done.wait [#allocation9], 256  }
  0x13   :  { %663 = vsyncadd [#allocation9], 4294967040  ;;  %v503_v0 = vld [vmem:[#allocation5] sm:$0xff]  ;;  %v505_v1 = vld [vmem:[#allocation7 + $0x8] sm:$0xff]  ;;  %vm107_vm0 = vcmask 130048   ;;  %v672_v4 = vmov 0  }
  0x14   :  { %v502_v2 = vld [vmem:[#allocation2] sm:$0xff]  ;;  %118 = vmatpush.bf16.msra.mxu0 %v503_v0  ;;  %156 = vmatpush.bf16.msra.mxu1 %v505_v1  ;;  %v504_v3 = vld [vmem:[#allocation7] sm:$0xff]  ;;  %vm132_vm1 = vcmask 1040384   ;;  %vm146_vm2 = vcmask 261120   ;;  %vm332_vm3 = vcmask 254976   ;;  %vm390_vm4 = vcmask 1041408  }
  0x15   :  { %179 = vmatpush.bf16.msra.mxu2 %v505_v1  ;;  %203 = vmatpush.bf16.msra.mxu3 %v505_v1  ;;  %v516_v6 = vld [vmem:[%s770_s3] ss:$0 sm:$0xff]  ;;  %vm392_vm5 = vcmask 1042432   ;;  %vm394_vm6 = vcmask 1043456   ;;  %vm396_vm7 = vcmask 1044480   ;;  %vm398_vm8 = vcmask 1045504  }
  0x16   :  { %vm400_vm9 = vcmask 1046528   ;;  %s673_s18 = smov [#allocation10]   ;;  %s457_s22 = sshll.u32 %s773_s6, 4  ;;  %s458_s22 = int_to_ptr.hbm [resolvable:$true] %s457_s22 }
  0x17   :  { %477 = vmatmul.msk.bf16.vlgmr.msra.gmra.mxu0 %vm107_vm0, %v502_v2  ;;  %s455_s19 = sshll.u32 %s673_s18, 4  ;;  %s456_s19 = int_to_ptr.vmem [resolvable:$true] %s455_s19 }
  0x18   :  { %227 = vmatpush.bf16.msrb.mxu0 %v505_v1  ;;  %157 = vmatpush.bf16.msra.mxu1 %v504_v3 }
  0x19   :  { %180 = vmatpush.bf16.msra.mxu2 %v504_v3  ;;  %204 = vmatpush.bf16.msra.mxu3 %v504_v3 }
  0x1b   :  { %158 = vmatmul.bf16.vlgmr.msra.gmra.mxu1 %v672_v4 }
  0x1c   :  { %228 = vmatpush.bf16.msrb.mxu0 %v504_v3  ;;  %251 = vmatpush.bf16.msrb.mxu1 %v505_v1 }
  0x1d   :  { %275 = vmatpush.bf16.msrb.mxu2 %v505_v1  ;;  %299 = vmatpush.bf16.msrb.mxu3 %v505_v1 }
  0x20   :  { %323 = vmatpush.bf16.msra.mxu0 %v505_v1  ;;  %252 = vmatpush.bf16.msrb.mxu1 %v504_v3 }
  0x21   :  { %276 = vmatpush.bf16.msrb.mxu2 %v504_v3  ;;  %300 = vmatpush.bf16.msrb.mxu3 %v504_v3 }
  0x24   :  { %324 = vmatpush.bf16.msra.mxu0 %v504_v3 }
  0x94   :  { %v120_v5 = vpop.f32.mrf.mxu0 }
  0x95   :  { %v121_v8 = vadd.f32 %v516_v6, %v120_v5 }
  0x97   :  { %v166_v11 = vrot.slane %v121_v8, 1  ;;  %v188_v12 = vrot.slane %v121_v8, 2  ;;  %v212_v13 = vrot.slane %v121_v8, 3  ;;  %v236_v14 = vrot.slane %v121_v8, 4 }
  0x98   :  { %v159_v7 = vpop.f32.mrf.mxu1  ;;  %v260_v15 = vrot.slane %v121_v8, 5  ;;  %v284_v16 = vrot.slane %v121_v8, 6  ;;  %v308_v29 = vrot.slane %v121_v8, 7 }
  0x9c   :  { %v122_v9 = vpop.f32.mrf.mxu0 }
  0x9d   :  { %v123_v10 = vadd.f32 %v516_v6, %v122_v9 }
  0x9f   :  { %v130_v17 = vrot.slane %v123_v10, 7  ;;  %v168_v18 = vsel %vm132_vm1, %v166_v11, %v123_v10  ;;  %v190_v19 = vrot.slane %v123_v10, 1  ;;  %v214_v20 = vrot.slane %v123_v10, 2 }
  0xa0   :  { %v161_v21 = vpop.f32.mrf.mxu1  ;;  %v238_v22 = vrot.slane %v123_v10, 3  ;;  %v262_v23 = vrot.slane %v123_v10, 4  ;;  %v286_v24 = vrot.slane %v123_v10, 5  ;;  %v310_v25 = vrot.slane %v123_v10, 6 }
  0xa1   :  { %v133_v26 = vsel %vm132_vm1, %v121_v8, %v130_v17  ;;  %v192_v27 = vsel %vm132_vm1, %v188_v12, %v190_v19  ;;  %v216_v28 = vsel %vm132_vm1, %v212_v13, %v214_v20 }
  0xa2   :  { %v163_v30 = vadd.f32 %v159_v7, %v133_v26  ;;  %v729_v31 = vsel %vm132_vm1, %v236_v14, %v238_v22  ;;  %v732_v32 = vsel %vm132_vm1, %v260_v15, %v262_v23  ;;  %v735_v33 = vsel %vm132_vm1, %v284_v16, %v286_v24 }
  0xa3   :  { %v738_v34 = vsel %vm132_vm1, %v308_v29, %v310_v25 }
  0xa4   :  { %518 = vtanh.f32 %v163_v30 }
  0xaa   :  { %v519_v35 = vpop.eup %518 }
  0xab   :  { %v169_v36 = vpack.c.bf16 %v519_v35, %v519_v35  ;;  %v333_v37 = vsel %vm332_vm3, %v519_v35, 0.0 }
  0xac   :  { %v334_v39 = vrot.slane %v333_v37, 4 }
  0xad   :  { %486 = vmatmul.msk.bf16.vlgmr.msra.gmra.mxu2 %vm146_vm2, %v169_v36 }
  0xae   :  { %v335_v41 = vadd.f32 %v334_v39, %v333_v37 }
  0xb0   :  { %v336_v44 = vrot.slane %v335_v41, 2 }
  0xb2   :  { %v337_v48 = vadd.f32 %v336_v44, %v335_v41 }
  0xb4   :  { %v338_v51 = vrot.slane %v337_v48, 1 }
  0xb6   :  { %v339_v54 = vadd.f32 %v338_v51, %v337_v48 }
 0x130   :  { %v182_v38 = vpop.f32.mrf.mxu2 }
 0x131   :  { %v186_v40 = vadd.f32 %v182_v38, %v168_v18 }
 0x133   :  { %520 = vtanh.f32 %v186_v40 }
 0x138   :  { %v184_v42 = vpop.f32.mrf.mxu2 }
 0x139   :  { %v521_v43 = vpop.eup %520 }
 0x13a   :  { %v340_v45 = vsel %vm332_vm3, %v521_v43, 0.0  ;;  %v193_v46 = vpack.c.bf16 %v521_v43, %v521_v43 }
 0x13b   :  { %v341_v47 = vrot.slane %v340_v45, 4 }
 0x13c   :  { %487 = vmatmul.msk.bf16.vlgmr.msra.gmra.mxu3 %vm146_vm2, %v193_v46 }
 0x13d   :  { %v342_v49 = vadd.f32 %v341_v47, %v340_v45 }
 0x13f   :  { %v343_v50 = vrot.slane %v342_v49, 2 }
 0x141   :  { %v344_v52 = vadd.f32 %v343_v50, %v342_v49 }
 0x143   :  { %v345_v53 = vrot.slane %v344_v52, 1 }
 0x145   :  { %v346_v55 = vadd.f32 %v345_v53, %v344_v52 }
 0x147   :  { %v389_v56 = vsel %vm132_vm1, %v339_v54, %v346_v55 }
 0x1bf   :  { %v206_v57 = vpop.f32.mrf.mxu3 }
 0x1c0   :  { %v210_v58 = vadd.f32 %v206_v57, %v192_v27 }
 0x1c2   :  { %522 = vtanh.f32 %v210_v58 }
 0x1c7   :  { %v208_v59 = vpop.f32.mrf.mxu3 }
 0x1c8   :  { %v523_v60 = vpop.eup %522 }
 0x1c9   :  { %v347_v61 = vsel %vm332_vm3, %v523_v60, 0.0  ;;  %v217_v62 = vpack.c.bf16 %v523_v60, %v523_v60  ;;  %v507_v60 = vld [vmem:[#allocation8 + $0x8] sm:$0xff] }
 0x1ca   :  { %v348_v63 = vrot.slane %v347_v61, 4  ;;  %432 = vmatpush.bf16.msra.mxu1 %v507_v60 }
 0x1cb   :  { %488 = vmatmul.msk.bf16.vlgmr.msrb.gmra.mxu0 %vm146_vm2, %v217_v62 }
 0x1cc   :  { %v349_v0 = vadd.f32 %v348_v63, %v347_v61  ;;  %v506_v61 = vld [vmem:[#allocation8] sm:$0xff] }
 0x1ce   :  { %v350_v1 = vrot.slane %v349_v0, 2  ;;  %433 = vmatpush.bf16.msra.mxu1 %v506_v61 }
 0x1d0   :  { %v351_v2 = vadd.f32 %v350_v1, %v349_v0 }
 0x1d2   :  { %v352_v3 = vrot.slane %v351_v2, 1 }
 0x1d4   :  { %v353_v4 = vadd.f32 %v352_v3, %v351_v2 }
 0x1d6   :  { %v391_v5 = vsel %vm390_vm4, %v389_v56, %v353_v4 }
 0x248   :  { %v230_v6 = vpop.f32.mrf.mxu0 }
 0x249   :  { %v234_v7 = vadd.f32 %v230_v6, %v216_v28 }
 0x24b   :  { %524 = vtanh.f32 %v234_v7 }
 0x250   :  { %v232_v8 = vpop.f32.mrf.mxu0 }
 0x251   :  { %v525_v9 = vpop.eup %524 }
 0x252   :  { %v354_v10 = vsel %vm332_vm3, %v525_v9, 0.0  ;;  %v241_v11 = vpack.c.bf16 %v525_v9, %v525_v9 }
 0x253   :  { %v355_v12 = vrot.slane %v354_v10, 4 }
 0x254   :  { %489 = vmatmul.msk.bf16.vlgmr.msrb.gmra.mxu1 %vm146_vm2, %v241_v11 }
 0x255   :  { %v356_v13 = vadd.f32 %v355_v12, %v354_v10 }
 0x257   :  { %v357_v14 = vrot.slane %v356_v13, 2 }
 0x259   :  { %v358_v15 = vadd.f32 %v357_v14, %v356_v13 }
 0x25b   :  { %v359_v16 = vrot.slane %v358_v15, 1 }
 0x25d   :  { %v360_v17 = vadd.f32 %v359_v16, %v358_v15 }
 0x25f   :  { %v393_v18 = vsel %vm392_vm5, %v391_v5, %v360_v17 }
 0x2d1   :  { %v254_v19 = vpop.f32.mrf.mxu1 }
 0x2d2   :  { %v258_v20 = vadd.f32 %v254_v19, %v729_v31 }
 0x2d4   :  { %526 = vtanh.f32 %v258_v20 }
 0x2d9   :  { %v256_v21 = vpop.f32.mrf.mxu1 }
 0x2da   :  { %v527_v22 = vpop.eup %526 }
 0x2db   :  { %v361_v23 = vsel %vm332_vm3, %v527_v22, 0.0  ;;  %v265_v24 = vpack.c.bf16 %v527_v22, %v527_v22 }
 0x2dc   :  { %v362_v25 = vrot.slane %v361_v23, 4 }
 0x2dd   :  { %490 = vmatmul.msk.bf16.vlgmr.msrb.gmra.mxu2 %vm146_vm2, %v265_v24 }
 0x2de   :  { %v363_v26 = vadd.f32 %v362_v25, %v361_v23 }
 0x2e0   :  { %v364_v27 = vrot.slane %v363_v26, 2 }
 0x2e2   :  { %v365_v28 = vadd.f32 %v364_v27, %v363_v26 }
 0x2e4   :  { %v366_v29 = vrot.slane %v365_v28, 1 }
 0x2e6   :  { %v367_v30 = vadd.f32 %v366_v29, %v365_v28 }
 0x2e8   :  { %v395_v35 = vsel %vm394_vm6, %v393_v18, %v367_v30 }
 0x360   :  { %v278_v36 = vpop.f32.mrf.mxu2 }
 0x361   :  { %v282_v37 = vadd.f32 %v278_v36, %v732_v32 }
 0x363   :  { %528 = vtanh.f32 %v282_v37 }
 0x368   :  { %v280_v31 = vpop.f32.mrf.mxu2 }
 0x369   :  { %v529_v38 = vpop.eup %528 }
 0x36a   :  { %v368_v39 = vsel %vm332_vm3, %v529_v38, 0.0  ;;  %v289_v40 = vpack.c.bf16 %v529_v38, %v529_v38 }
 0x36b   :  { %v369_v41 = vrot.slane %v368_v39, 4 }
 0x36c   :  { %491 = vmatmul.msk.bf16.vlgmr.msrb.gmra.mxu3 %vm146_vm2, %v289_v40 }
 0x36d   :  { %v370_v42 = vadd.f32 %v369_v41, %v368_v39 }
 0x36f   :  { %v371_v43 = vrot.slane %v370_v42, 2 }
 0x371   :  { %v372_v44 = vadd.f32 %v371_v43, %v370_v42 }
 0x373   :  { %v373_v45 = vrot.slane %v372_v44, 1 }
 0x375   :  { %v374_v46 = vadd.f32 %v373_v45, %v372_v44 }
 0x377   :  { %v397_v47 = vsel %vm396_vm7, %v395_v35, %v374_v46 }
 0x3ef   :  { %v302_v48 = vpop.f32.mrf.mxu3 }
 0x3f0   :  { %v306_v49 = vadd.f32 %v302_v48, %v735_v33 }
 0x3f2   :  { %530 = vtanh.f32 %v306_v49 }
 0x3f7   :  { %v304_v32 = vpop.f32.mrf.mxu3 }
 0x3f8   :  { %v531_v50 = vpop.eup %530 }
 0x3f9   :  { %v313_v51 = vpack.c.bf16 %v531_v50, %v531_v50  ;;  %v375_v52 = vsel %vm332_vm3, %v531_v50, 0.0 }
 0x3fa   :  { %v376_v53 = vrot.slane %v375_v52, 4 }
 0x3fb   :  { %492 = vmatmul.msk.bf16.vlgmr.msra.gmra.mxu0 %vm146_vm2, %v313_v51 }
 0x3fc   :  { %v377_v54 = vadd.f32 %v376_v53, %v375_v52 }
 0x3fe   :  { %v378_v55 = vrot.slane %v377_v54, 2 }
 0x400   :  { %v379_v56 = vadd.f32 %v378_v55, %v377_v54 }
 0x402   :  { %v380_v57 = vrot.slane %v379_v56, 1 }
 0x404   :  { %v381_v58 = vadd.f32 %v380_v57, %v379_v56 }
 0x406   :  { %v399_v59 = vsel %vm398_vm8, %v397_v47, %v381_v58 }
 0x478   :  { %v326_v33 = vpop.f32.mrf.mxu0 }
 0x479   :  { %v330_v62 = vadd.f32 %v326_v33, %v738_v34  ;;  %v517_v34 = vld [vmem:[%s772_s5] ss:$0 sm:$0xff] }
 0x47b   :  { %532 = vtanh.f32 %v330_v62 }
 0x480   :  { %v328_v63 = vpop.f32.mrf.mxu0 }
 0x481   :  { %v533_v0 = vpop.eup %532 }
 0x482   :  { %v382_v1 = vsel %vm332_vm3, %v533_v0, 0.0 }
 0x483   :  { %v383_v2 = vrot.slane %v382_v1, 4 }
 0x485   :  { %v384_v3 = vadd.f32 %v383_v2, %v382_v1 }
 0x487   :  { %v385_v4 = vrot.slane %v384_v3, 2 }
 0x489   :  { %v386_v5 = vadd.f32 %v385_v4, %v384_v3 }
 0x48b   :  { %v387_v6 = vrot.slane %v386_v5, 1 }
 0x48d   :  { %v388_v7 = vadd.f32 %v387_v6, %v386_v5 }
 0x48f   :  { %v401_v8 = vsel %vm400_vm9, %v399_v59, %v388_v7 }
 0x490   :  { %v402_v9 = vpack.c.bf16 %v401_v8, %v401_v8 }
 0x492   :  { %501 = vmatmul.msk.bf16.vlgmr.msra.gmra.mxu1 %vm146_vm2, %v402_v9 }
 0x50f   :  { %v435_v10 = vpop.f32.mrf.mxu1 }
 0x510   :  { %v436_v11 = vadd.f32 %v517_v34, %v435_v10 }
 0x512   :  { %439 = vmax.xlane.f32.xlu0 %v436_v11 }
 0x517   :  { %v437_v12 = vpop.f32.mrf.mxu1 }
 0x585   :  { %v440_v13 = vpop.xlane.xlu0 %439 }
 0x586   :  { %v441_v14 = vsub.f32 %v436_v11, %v440_v13 }
 0x588   :  { %v442_v15 = vmul.f32 1.442695, %v441_v14 }
 0x58a   :  { %534 = vpow2.f32 %v442_v15 }
 0x590   :  { %v535_v16 = vpop.eup %534 }
 0x591   :  { %444 = vadd.xlane.f32.xlu0 %v535_v16 }
 0x604   :  { %v445_v17 = vpop.xlane.xlu0 %444 }
 0x605   :  { %536 = vlog2.f32 %v445_v17 }
 0x60b   :  { %v537_v18 = vpop.eup %536 }
 0x60c   :  { %v447_v19 = vmul.f32 0.6931472, %v537_v18 }
 0x60e   :  { %v448_v20 = vsub.f32 %v441_v14, %v447_v19 }
 0x610   :  { %449 = vst [vmem:[#allocation10] sm:$0xff] %v448_v20 }
 0x611   :  { %460 = dma.vmem_to_hbm [thread:$0]  %s456_s19, 128, %s458_s22, [#allocation4]  }
 0x612   :  { %664 = dma.done.wait [#allocation4], 128  }
 0x613   :  { %665 = vsyncadd [#allocation4], 4294967168 }
 0x614   :  { %465 = vsyncpa [#allocation3], 1 }
 0x615   :  { %466 = vsyncpa [#allocation6], 1 }
 0x616   :  { %467 = vsyncpa [#allocation9], 1 }
 0x617   :  { %468 = vsyncpa [#allocation4], 1 }

</bundles_post_ra>
